<compile_context>
chip_gen: v7x
topology: tpu7x:2x2x1
jax: 0.10.0
libtpu: 0.0.40
codegen_flags: <defaults>
</compile_context>

<pallas_src>
import functools

import jax
import jax.numpy as jnp
from jax.experimental import pallas as pl
from jax.experimental.pallas import tpu as pltpu


def gcn_encoder_kernel(a_ref, x_hbm, w_ref, b_ref, o_ref,
                       x_scr, xw_scr, x_sem, *, tm, graph_resident):
    """Fused GCN encoder.  Grid = (layer, row_tile).

    Per step:
      - (l==0, i==0): one-time DMA of the input features HBM -> x_scr.
      - (l, i==0):    xw_scr = X @ W_l          (f32 acc, stored compute dtype)
      - every (l, i): h = relu(A[rows_i,:] @ XW + b_l)   (f32 epilogue)
                      rows_i of x_scr <- h ; output tile <- h.
    """
    l = pl.program_id(0)
    i = pl.program_id(1)

    # One-time load of the input features into the resident scratch
    # (x is a raw memory_space=ANY ref -> single manual DMA, no double buffer).
    @pl.when((l == 0) & (i == 0))
    def _():
        cp = pltpu.make_async_copy(x_hbm, x_scr, x_sem)
        cp.start()
        cp.wait()

    # Per-layer feature transform X @ W_l (bias is added after aggregation so
    # the result equals relu(A @ X @ W + b)).
    @pl.when(i == 0)
    def _():
        xw = jnp.dot(x_scr[...], w_ref[0], preferred_element_type=jnp.float32)
        xw_scr[...] = xw.astype(xw_scr.dtype)

    row0 = pl.multiple_of(i * tm, tm)
    if graph_resident:
        a_tile = a_ref[pl.ds(row0, tm), :]   # slice the resident (N,N) graph
    else:
        a_tile = a_ref[...]                  # streamed (TM,N) row tile

    # Row-tile aggregation on the MXU (bf16 x bf16 -> f32 accumulate).
    h = jnp.dot(a_tile, xw_scr[...], preferred_element_type=jnp.float32)
    # Epilogue on the VPU, kept in f32.
    h = jnp.maximum(h + b_ref[0], 0.0)

    # Carry the new features for the next layer (compute dtype).
    x_scr[pl.ds(row0, tm), :] = h.astype(x_scr.dtype)
    # Lane-dense (TM,H) output tile, written every layer; the last layer's
    # writes land last, so HBM ends with the final-layer result.
    o_ref[...] = h.astype(o_ref.dtype)


def gcn_encoder(x, graph, w_stack, b_stack, *, tm=256,
                compute_dtype=jnp.bfloat16, graph_resident=None,
                vmem_budget_bytes=48 * 1024 * 1024):
    """GCNEncoder.forward for x:(N,H), graph:(N,N), W:(L,H,H), b:(L,1,H)."""
    N, H = x.shape
    L = w_stack.shape[0]
    tm = min(tm, N)
    assert N % tm == 0, "n_nodes must be a multiple of the row tile"
    assert tm % 128 == 0 and H % 128 == 0, "keep tiles MXU/lane aligned"

    cbytes = jnp.dtype(compute_dtype).itemsize
    obytes = jnp.dtype(x.dtype).itemsize

    def vmem_estimate(resident):
        graph_b = 2 * N * N * cbytes if resident else 3 * tm * N * cbytes
        scratch_b = 2 * N * H * cbytes                 # x_scr + xw_scr
        param_b = 2 * (H * H * cbytes + H * 4)          # double-buffered W, b
        out_b = 2 * tm * H * obytes                     # double-buffered out tile
        return graph_b + scratch_b + param_b + out_b

    if graph_resident is None:
        # Keep the graph on-chip whenever it fits the budget (saves (L-1)/L of
        # all HBM traffic for multi-layer stacks); otherwise stream row tiles.
        graph_resident = vmem_estimate(True) <= vmem_budget_bytes
    est = vmem_estimate(graph_resident)
    # Explicit scoped-VMEM limit (matters on v7x: 64 MiB physical).
    vmem_limit = int(min(max(2 * est, 32 * 1024 * 1024), 60 * 1024 * 1024))

    # bf16 operands in HBM -> halved DMA bytes for the dominant graph stream.
    graph_c = graph.astype(compute_dtype)
    x_c = x.astype(compute_dtype)
    w_c = w_stack.astype(compute_dtype)
    b_f32 = b_stack.astype(jnp.float32)

    if graph_resident:
        graph_spec = pl.BlockSpec((N, N), lambda l, i: (0, 0))
    else:
        # 3-deep buffering hides the layer-boundary DMA restart behind the
        # serial (N,H)@(H,H) XW matmul at i == 0.
        graph_spec = pl.BlockSpec((tm, N), lambda l, i: (i, 0),
                                  pipeline_mode=pl.Buffered(3))

    kernel = functools.partial(gcn_encoder_kernel, tm=tm,
                               graph_resident=graph_resident)
    return pl.pallas_call(
        kernel,
        out_shape=jax.ShapeDtypeStruct((N, H), x.dtype),
        grid_spec=pltpu.PrefetchScalarGridSpec(
            num_scalar_prefetch=0,
            grid=(L, N // tm),
            in_specs=[
                graph_spec,
                # x: raw HBM ref, one manual DMA into x_scr (no pipelined block).
                pl.BlockSpec(memory_space=pl.ANY),
                # per-layer weight / bias: block index changes only with l.
                pl.BlockSpec((1, H, H), lambda l, i: (l, 0, 0)),
                pl.BlockSpec((1, 1, H), lambda l, i: (l, 0, 0)),
            ],
            # Per-row-tile lane-dense output; revisited each layer (cheap:
            # N*H per layer vs N*N graph reads per layer).
            out_specs=pl.BlockSpec((tm, H), lambda l, i: (i, 0)),
            scratch_shapes=[
                pltpu.VMEM((N, H), compute_dtype),  # resident node features X
                pltpu.VMEM((N, H), compute_dtype),  # X @ W_l for current layer
                pltpu.SemaphoreType.DMA(()),        # one-time x DMA
            ],
        ),
        compiler_params=pltpu.CompilerParams(
            # Both axes carry the resident scratches -> must stay sequential.
            dimension_semantics=("arbitrary", "arbitrary"),
            vmem_limit_bytes=vmem_limit,
        ),
    )(graph_c, x_c, w_c, b_f32)


def init_params(key, hid_size, layer_num):
    """Deterministic stacked per-layer parameters: W (L,H,H), b (L,1,H)."""
    ws, bs = [], []
    for i in range(layer_num):
        kw, kb = jax.random.split(jax.random.fold_in(key, i))
        ws.append(
            jax.random.normal(kw, (hid_size, hid_size), jnp.float32)
            / jnp.sqrt(hid_size)
        )
        bs.append(jax.random.normal(kb, (1, hid_size), jnp.float32) * 0.01)
    return jnp.stack(ws), jnp.stack(bs)


def make_normalized_graph(key, n_nodes):
    """Random symmetric adjacency with self-loops, D^-1/2 A D^-1/2 normalized."""
    a = (jax.random.uniform(key, (n_nodes, n_nodes)) > 0.5).astype(jnp.float32)
    a = jnp.maximum(a, a.T)
    a = a + jnp.eye(n_nodes, dtype=jnp.float32)
    a = jnp.minimum(a, 1.0)
    deg = jnp.sum(a, axis=1)
    d_inv_sqrt = 1.0 / jnp.sqrt(deg)
    return a * d_inv_sqrt[:, None] * d_inv_sqrt[None, :]


if __name__ == "__main__":
    hid_size = 128   # lane-dense feature dim (multiple of 128)
    layer_num = 3
    n_nodes = 256    # multiple of the row tile

    root = jax.random.PRNGKey(0)
    kx, kg, kp = jax.random.split(root, 3)

    x = jax.random.normal(kx, (n_nodes, hid_size), jnp.float32)
    graph = make_normalized_graph(kg, n_nodes)
    w_stack, b_stack = init_params(kp, hid_size, layer_num)

    # Pure-JAX f32 reference (original association: (A @ X) @ W + b).
    ref = x
    for l in range(layer_num):
        ref = jnp.maximum(graph @ ref @ w_stack[l] + b_stack[l], 0.0)

    # 1) Fast path: bf16 operands, tm=256, graph auto-resident in VMEM.
    out_fast = jax.block_until_ready(
        gcn_encoder(x, graph, w_stack, b_stack, tm=256))
    assert out_fast.shape == (n_nodes, hid_size)
    err_fast = float(jnp.max(jnp.abs(out_fast - ref)))
    assert jnp.allclose(out_fast, ref, atol=5e-2, rtol=5e-2), \
        f"bf16 fast path max abs err {err_fast}"

    # 2) bf16, multiple row tiles per layer, graph forced resident
    #    (exercises the dynamic pl.ds slicing of the resident graph).
    out_tiles = jax.block_until_ready(
        gcn_encoder(x, graph, w_stack, b_stack, tm=128, graph_resident=True))
    err_tiles = float(jnp.max(jnp.abs(out_tiles - ref)))
    assert jnp.allclose(out_tiles, ref, atol=5e-2, rtol=5e-2), \
        f"bf16 tiled path max abs err {err_tiles}"

    # 3) f32 streaming path: tight check of the kernel structure itself
    #    (also exercises the (TM,N) streamed / Buffered(3) graph spec).
    out_f32 = jax.block_until_ready(
        gcn_encoder(x, graph, w_stack, b_stack, tm=128,
                    graph_resident=False, compute_dtype=jnp.float32))
    err_f32 = float(jnp.max(jnp.abs(out_f32 - ref)))
    assert jnp.allclose(out_f32, ref, atol=1e-3, rtol=1e-3), \
        f"f32 streaming path max abs err {err_f32}"

    print("KERNEL_OK")
</pallas_src>

<mosaic_0001>
module attributes {stable_mosaic.version = 11 : i64} {
  func.func @gcn_encoder_kernel(%arg0: i32, %arg1: i32, %arg2: memref<256x256xbf16, #tpu.memory_space<vmem>>, %arg3: memref<256x128xbf16, #tpu.memory_space<any>>, %arg4: memref<1x128x128xbf16, #tpu.memory_space<vmem>>, %arg5: memref<1x1x128xf32, #tpu.memory_space<vmem>>, %arg6: memref<256x128xf32, #tpu.memory_space<vmem>>, %arg7: memref<256x128xbf16, #tpu.memory_space<vmem>>, %arg8: memref<256x128xbf16, #tpu.memory_space<vmem>>, %arg9: memref<!tpu.dma_semaphore, #tpu.memory_space<semaphore_mem>>) attributes {dimension_semantics = [#tpu.dimension_semantics<arbitrary>, #tpu.dimension_semantics<arbitrary>], iteration_bounds = array<i64: 3, 1>, scalar_prefetch = 0 : i64, scratch_operands = 3 : i64, tpu.core_type = #tpu.core_type<tc>, window_params = [{pipeline_mode = #tpu.pipeline_mode<synchronous>, transform_indices = @transform_0, window_bounds = array<i64: 256, 256>}, {}, {transform_indices = @transform_2, window_bounds = array<i64: 1, 128, 128>}, {transform_indices = @transform_3, window_bounds = array<i64: 1, 1, 128>}, {transform_indices = @transform_4, window_bounds = array<i64: 256, 128>}]} {
    %c0_i32 = arith.constant 0 : i32
    %0 = arith.cmpi eq, %arg0, %c0_i32 : i32
    %c0_i32_0 = arith.constant 0 : i32
    %1 = arith.cmpi eq, %arg1, %c0_i32_0 : i32
    %2 = arith.andi %0, %1 : i1
    %3 = arith.extui %2 : i1 to i32
    %c0_i32_1 = arith.constant 0 : i32
    %4 = arith.cmpi ne, %3, %c0_i32_1 : i32
    scf.if %4 {
      tpu.enqueue_dma source(%arg3 : memref<256x128xbf16, #tpu.memory_space<any>>) target(%arg7 : memref<256x128xbf16, #tpu.memory_space<vmem>>) target_semaphore(%arg9 : memref<!tpu.dma_semaphore, #tpu.memory_space<semaphore_mem>>)
      tpu.wait_dma2 semaphore(%arg9 : memref<!tpu.dma_semaphore, #tpu.memory_space<semaphore_mem>>) src(%arg3 : memref<256x128xbf16, #tpu.memory_space<any>>) dst(%arg7 : memref<256x128xbf16, #tpu.memory_space<vmem>>)
    } else {
    }
    %c0_i32_2 = arith.constant 0 : i32
    %5 = arith.cmpi eq, %arg1, %c0_i32_2 : i32
    %6 = arith.extui %5 : i1 to i32
    %c0_i32_3 = arith.constant 0 : i32
    %7 = arith.cmpi ne, %6, %c0_i32_3 : i32
    scf.if %7 {
      %c0_13 = arith.constant 0 : index
      %c0_14 = arith.constant 0 : index
      %24 = vector.load %arg7[%c0_13, %c0_14] : memref<256x128xbf16, #tpu.memory_space<vmem>>, vector<256x128xbf16>
      %c0_15 = arith.constant 0 : index
      %c0_16 = arith.constant 0 : index
      %c0_17 = arith.constant 0 : index
      %25 = vector.load %arg4[%c0_15, %c0_16, %c0_17] : memref<1x128x128xbf16, #tpu.memory_space<vmem>>, vector<1x128x128xbf16>
      %26 = vector.shape_cast %25 : vector<1x128x128xbf16> to vector<128x128xbf16>
      %cst_18 = arith.constant dense<0.000000e+00> : vector<256x128xf32>
      %27 = tpu.matmul %24, %26, %cst_18 {dimension_numbers = #tpu.dot_dimension_numbers<[1], [0], [0], [1], [0, 0, 1, 1], [], []>} : vector<256x128xbf16>, vector<128x128xbf16>, vector<256x128xf32> -> vector<256x128xf32>
      %28 = arith.truncf %27 : vector<256x128xf32> to vector<256x128xbf16>
      %c0_19 = arith.constant 0 : index
      %c0_20 = arith.constant 0 : index
      %29 = vector.load %arg8[%c0_19, %c0_20] : memref<256x128xbf16, #tpu.memory_space<vmem>>, vector<256x128xbf16>
      tpu.vector_store %arg8[%c0_19, %c0_20], %28 {strides = array<i32>} : memref<256x128xbf16, #tpu.memory_space<vmem>>, vector<256x128xbf16>,
    } else {
    }
    %c256_i32 = arith.constant 256 : i32
    %8 = arith.muli %arg1, %c256_i32 : i32
    %9 = tpu.assume_multiple %8, 256 : i32
    %10 = arith.index_cast %9 : i32 to index
    %c0 = arith.constant 0 : index
    %11 = vector.load %arg2[%10, %c0] : memref<256x256xbf16, #tpu.memory_space<vmem>>, vector<256x256xbf16>
    %c0_4 = arith.constant 0 : index
    %c0_5 = arith.constant 0 : index
    %12 = vector.load %arg8[%c0_4, %c0_5] : memref<256x128xbf16, #tpu.memory_space<vmem>>, vector<256x128xbf16>
    %cst = arith.constant dense<0.000000e+00> : vector<256x128xf32>
    %13 = tpu.matmul %11, %12, %cst {dimension_numbers = #tpu.dot_dimension_numbers<[1], [0], [0], [1], [0, 0, 1, 1], [], []>} : vector<256x256xbf16>, vector<256x128xbf16>, vector<256x128xf32> -> vector<256x128xf32>
    %c0_6 = arith.constant 0 : index
    %c0_7 = arith.constant 0 : index
    %c0_8 = arith.constant 0 : index
    %14 = vector.load %arg5[%c0_6, %c0_7, %c0_8] : memref<1x1x128xf32, #tpu.memory_space<vmem>>, vector<1x1x128xf32>
    %15 = vector.shape_cast %14 : vector<1x1x128xf32> to vector<1x128xf32>
    %16 = vector.broadcast %15 : vector<1x128xf32> to vector<256x128xf32>
    %17 = arith.addf %13, %16 : vector<256x128xf32>
    %cst_9 = arith.constant 0.000000e+00 : f32
    %18 = vector.broadcast %cst_9 : f32 to vector<256x128xf32>
    %19 = arith.maximumf %17, %18 : vector<256x128xf32>
    %20 = arith.truncf %19 : vector<256x128xf32> to vector<256x128xbf16>
    %21 = arith.index_cast %9 : i32 to index
    %c0_10 = arith.constant 0 : index
    %22 = vector.load %arg7[%21, %c0_10] : memref<256x128xbf16, #tpu.memory_space<vmem>>, vector<256x128xbf16>
    tpu.vector_store %arg7[%21, %c0_10], %20 {strides = array<i32>} : memref<256x128xbf16, #tpu.memory_space<vmem>>, vector<256x128xbf16>,
    %c0_11 = arith.constant 0 : index
    %c0_12 = arith.constant 0 : index
    %23 = vector.load %arg6[%c0_11, %c0_12] : memref<256x128xf32, #tpu.memory_space<vmem>>, vector<256x128xf32>
    tpu.vector_store %arg6[%c0_11, %c0_12], %19 {strides = array<i32>} : memref<256x128xf32, #tpu.memory_space<vmem>>, vector<256x128xf32>,
    return
  }
  func.func @transform_0(%arg0: i32, %arg1: i32) -> (i32, i32) {
    %c0_i32 = arith.constant 0 : i32
    %c0_i32_0 = arith.constant 0 : i32
    %c0_i32_1 = arith.constant 0 : i32
    return %c0_i32, %c0_i32_0 : i32, i32
  }
  func.func @transform_2(%arg0: i32, %arg1: i32) -> (i32, i32, i32) {
    %c0_i32 = arith.constant 0 : i32
    %c0_i32_0 = arith.constant 0 : i32
    %c0_i32_1 = arith.constant 0 : i32
    return %arg0, %c0_i32, %c0_i32_0 : i32, i32, i32
  }
  func.func @transform_3(%arg0: i32, %arg1: i32) -> (i32, i32, i32) {
    %c0_i32 = arith.constant 0 : i32
    %c0_i32_0 = arith.constant 0 : i32
    %c0_i32_1 = arith.constant 0 : i32
    return %arg0, %c0_i32, %c0_i32_0 : i32, i32, i32
  }
  func.func @transform_4(%arg0: i32, %arg1: i32) -> (i32, i32) {
    %c0_i32 = arith.constant 0 : i32
    %c0_i32_0 = arith.constant 0 : i32
    return %arg1, %c0_i32 : i32, i32
  }
}

</mosaic_0001>

<bundles_post_ra>
// kernel: tpu_custom_call.1
= control target key start
LH: loop header
LB: loop body
LE: loop exit
PB: predicated region body
PF: predicated region fallthrough
CT: control target
= control target key end

     0   :  { %9 = vsyncpa [#allocation6], 0  ;;  %s1978_s0 = inlined_call_operand.hbm [shape: bf16[256,256], index: 0, kind: input, shape index: {}]   ;;  %s1979_s1 = inlined_call_operand.hbm [shape: bf16[256,128], index: 1, kind: input, shape index: {}]   ;;  %s1980_s2 = inlined_call_operand.hbm [shape: bf16[3,128,128], index: 2, kind: input, shape index: {}]   ;;  %s1981_s3 = inlined_call_operand.vmem [shape: f32[3,1,128], index: 3, kind: input, shape index: {}]   ;;  %s1982_s4 = inlined_call_operand.hbm [shape: f32[256,128], index: 4, kind: output, shape index: {}]  }
   0x1   :  { %10 = vsyncpa [#allocation9], 0 }
   0x2   :  { %12 = vsyncpa [#allocation9 + $0x1], 0 }
   0x3   :  { %13 = vsyncpa [#allocation7], 0  ;;  %s1715_s15 = smov 0   ;;  %s1717_s16 = smov 0  }
   0x4   :  { %s1719_s17 = smov 0   ;;  %s1721_s18 = smov 0  }
   0x5   :  { %s1723_s19 = smov 0   ;;  %s1725_s20 = smov 0  }
   0x6 LB: > { %s1109_s21 = sadd.s32 4294967295, %s1678_s20   ;;  %p72_p0 = scmp.ne.s32.totalorder %s1662_s16, %s1658_s15  ;;  %s1678_s20 = sphi %s1725_s20, %s19_s20   ;;  %s1674_s19 = sphi %s1723_s19, %s2000_s19   ;;  %s1670_s18 = sphi %s1721_s18, %s1999_s18   ;;  %s1666_s17 = sphi %s1719_s17, %s1998_s17   ;;  %s1662_s16 = sphi %s1717_s16, %s1997_s16   ;;  %s1658_s15 = sphi %s1715_s15, %s1996_s15  }
   0x7   : > { %p1747_p1 = scmp.eq.s32.totalorder %s1109_s21, 0  ;;  %p1110_p2 = scmp.ge.s32.totalorder %s1678_s20, 1 }
   0x8   : > { %p135_p3 = scmp.lt.s32.totalorder %s1678_s20, 4  ;;  %s1680_s25 = smov [#allocation5]  }
   0x9   : > { %s1987_s22 = scalar_select %p1747_p1, 1, 0 }
   0xa   : > { %p1755_p4 = por %p1747_p1, %p72_p0  ;;  %p1759_p5 = pnand %p1110_p2, %p135_p3 }
   0xb   : > { %s147_s26 = sshll.u32 %s1680_s25, 4  ;;  %s31_s28 = sadd.s32 1, %s1674_s19  ;;  %s148_s26 = int_to_ptr.vmem [resolvable:$true] %s147_s26 }
   0xc   : > { %s1988_s23 = scalar_select %p1755_p4, 1, 0 }
   0xd   : > { %s1989_s24 = scalar_select %p1759_p5, 1, 0 }
   0xe   : > { %p1380_p6 = pneg %p1759_p5  ;;  %s1506_s5 = scalar_lea.hbm %s1978_s0, 4096 }
   0xf   : > { %p1507_p8 = scmp.ne.s32.totalorder %s1978_s0, %s1506_s5  ;;  %p1513_p12 = scmp.lt.u32.totalorder %s1506_s5, %s1978_s0 }
  0x10   : > { %p1767_p7 = pnand %p1380_p6, %p1747_p1 }
  0x12   : > { %p1508_p9 = pneg %p1767_p7 }
  0x14   : > { %p1509_p10 = pnand %p1508_p9, %p1507_p8 }
  0x16   : > { %p1510_p11 = pneg %p1509_p10 }
  0x18   : > { %p1515_p13 = pnand %p1513_p12, %p1510_p11 }
  0x1a   : > { %1518 = shalt.err (!%p1515_p13)
}
  0x1b   : > { %s1519_s10 = scalar_lea.vmem %s148_s26, 4096  ;;  %p1527_p6 = scmp.lt.s32.totalorder %s148_s26, %s148_s26 }
  0x1c   : > { %p1520_p0 = scmp.ne.s32.totalorder %s148_s26, %s1519_s10  ;;  %p1528_p4 = scmp.lt.s32.totalorder %s1519_s10, %s1519_s10 }
  0x1e   : > { %p1522_p2 = pnand %p1520_p0, %p1508_p9  ;;  %p1529_p1 = por %p1528_p4, %p1527_p6 }
  0x20   : > { %p1523_p3 = pneg %p1522_p2 }
  0x22   : > { %p1530_p5 = pnand %p1529_p1, %p1523_p3 }
  0x24   : > { %1533 = shalt.err (!%p1530_p5)
}
  0x25   : > { %s1681_s11 = smov 128   ;;  %s1682_s12 = smov 8  }
  0x26   : > { %1383 = dma.hbm_to_vmem [thread:$0]  (!%p1767_p7), %s1978_s0, 4096, %s148_s26, [#allocation6], %s1681_s11, %s1681_s11, %s1682_s12  }
  0x27   : > { %p33_p4 = scmp.ge.s32.totalorder %s31_s28, 3  ;;  %s59_s15 = sadd.s32 1, %s1666_s17 }
  0x28   : > { %p66_p1 = scmp.ne.s32.totalorder %s1666_s17, %s1662_s16  ;;  %p67_p5 = scmp.eq.s32.totalorder %s1678_s20, 0 }
  0x29   : > { %s2002_s28 = smov (%p33_p4, %s31_s28), 0  ;;  %p1389_p9 = scmp.lt.s32.totalorder %s1678_s20, 3 }
  0x2a   : > { %p68_p8 = por %p67_p5, %p66_p1  ;;  %s56_s25 = ssub.s32 %s1674_s19, %s2002_s28 }
  0x2b   : > { %s161_s29 = sand.u32 1, %s1666_s17   ;;  %p57_p10 = scmp.eq.s32.totalorder %s56_s25, 0 }
  0x2c   : > { %s1113_s30 = sshll.u32 %s161_s29, 6  ;;  %s1166_s5 = sshll.u32 %s1674_s19, 10 }
  0x2d   : > { %s1800_s6 = scalar_select %p57_p10, %s1666_s17, %s59_s15  }
  0x2e   : > { %s1805_s26 = scalar_lea.hbm %s1980_s2, %s1166_s5  ;;  %s165_s8 = scalar_lea.vmem [#allocation8], %s1113_s30 }
  0x2f   : > { %s172_s9 = sshll.u32 %s165_s8, 4  ;;  %p1807_p7 = pnand %p1389_p9, %p68_p8  ;;  %s1811_s9 = int_to_ptr.vmem [resolvable:$true] %s172_s9 }
  0x30   : > { %s1813_s11 = scalar_lea.sflag [#allocation9], %s161_s29  ;;  %s1534_s12 = scalar_lea.hbm %s1805_s26, 1024 }
  0x31   : > { %p1535_p11 = scmp.ne.s32.totalorder %s1805_s26, %s1534_s12  ;;  %p1536_p12 = pneg %p1807_p7 }
  0x32   : > { %s1539_s15 = scalar_lea.hbm %s1980_s2, 3072  ;;  %p1540_p2 = scmp.lt.u32.totalorder %s1805_s26, %s1980_s2 }
  0x33   : > { %p1537_p13 = pnand %p1536_p12, %p1535_p11  ;;  %p1541_p3 = scmp.lt.u32.totalorder %s1539_s15, %s1534_s12 }
  0x34   : > { %p1543_p4 = scmp.lt.u32.totalorder %s1534_s12, %s1805_s26 }
  0x35   : > { %p1538_p0 = pneg %p1537_p13  ;;  %p1542_p6 = por %p1541_p3, %p1540_p2 }
  0x37   : > { %p1544_p1 = por %p1543_p4, %p1542_p6 }
  0x39   : > { %p1545_p5 = pnand %p1544_p1, %p1538_p0 }
  0x3b   : > { %1548 = shalt.err (!%p1545_p5)
}
  0x3c   : > { %s1549_s29 = scalar_lea.vmem %s1811_s9, 1024  ;;  %s1683_s5 = smov [#allocation8]  }
  0x3d   : > { %p1550_p8 = scmp.ne.s32.totalorder %s1811_s9, %s1549_s29  ;;  %s1554_s27 = sshll.u32 %s1683_s5, 4  ;;  %s1555_s27 = int_to_ptr.vmem [resolvable:$false] %s1554_s27 }
  0x3e   : > { %s1556_s7 = scalar_lea.vmem %s1555_s27, 2048  ;;  %p1557_p11 = scmp.lt.s32.totalorder %s1811_s9, %s1555_s27 }
  0x3f   : > { %p1552_p9 = pnand %p1550_p8, %p1536_p12  ;;  %p1558_p13 = scmp.lt.s32.totalorder %s1556_s7, %s1549_s29 }
  0x41   : > { %p1553_p10 = pneg %p1552_p9  ;;  %p1559_p2 = por %p1558_p13, %p1557_p11 }
  0x43   : > { %p1560_p3 = pnand %p1559_p2, %p1553_p10 }
  0x45   : > { %1563 = shalt.err (!%p1560_p3)
}
  0x46   : > { %s1684_s8 = smov 64   ;;  %s1685_s12 = smov 4  }
  0x47   : > { %1387 = dma.hbm_to_vmem [thread:$0]  (!%p1807_p7), %s1805_s26, 1024, %s1811_s9, %s1813_s11, %s1684_s8, %s1684_s8, %s1685_s12  }
  0x48   : > { %p1992_p12 = scmp.ne.s32.totalorder %s1989_s24, 0 }
  0x49   : > { %p1993_p0 = scmp.ne.s32.totalorder (!%p1992_p12), %s1987_s22, 0 }
  0x4a   : > { %190 = sbr.rel (%p1992_p12) target bundleno = 749 (0x2ed), region = 32 }
  0x51   : > { %1641 = dma.done.wait (%p1993_p0), [#allocation6], 4096  }
  0x52   : > { %1643 = vsyncadd (%p1993_p0), [#allocation6], 4294963200  ;;  %s196_s13 = sand.u32 1, %s1662_s16   ;;  %p1994_p6 = scmp.ne.s32.totalorder %s1988_s23, 0 }
  0x53   : > { %s1118_s14 = sshll.u32 %s196_s13, 6  ;;  %s197_s15 = scalar_lea.sflag [#allocation9], %s196_s13 }
  0x54   : > { %s1848_s25 = scalar_lea.vmem [#allocation8], %s1118_s14 }
  0x55   : > { %1645 = dma.done.wait (%p1994_p6), %s197_s15, 1024  }
  0x56   : > { %1647 = vsyncadd (%p1994_p6), %s197_s15, 4294966272  ;;  %p221_p7 = scmp.lt.s32.totalorder %s1670_s18, 2  ;;  %p226_p4 = scmp.eq.s32.totalorder %s1670_s18, 0 }
  0x57   : > { %s1686_s24 = smov [#allocation2]   ;;  %s1564_s23 = scalar_lea.hbm %s1979_s1, 2048 }
  0x58   : > { %s1857_s22 = scalar_select %p221_p7, %s1670_s18, 2 }
  0x59   : > { %s239_s26 = sshll.u32 %s1686_s24, 4  ;;  %p1565_p1 = scmp.ne.s32.totalorder %s1979_s1, %s1564_s23  ;;  %s240_s26 = int_to_ptr.vmem [resolvable:$true] %s239_s26 }
  0x5a   : > { %s223_s11 = scalar_lea.vmem %s1981_s3, %s1857_s22  ;;  %p1570_p9 = scmp.lt.u32.totalorder %s1564_s23, %s1979_s1 }
  0x5b   : > { %p1566_p5 = pnand %p1565_p1, %p226_p4 }
  0x5d   : > { %p1567_p8 = pneg %p1566_p5 }
  0x5f   : > { %p1572_p10 = pnand %p1570_p9, %p1567_p8 }
  0x61   : > { %1575 = shalt.err (!%p1572_p10)  }
  0x62   : > { %s1576_s12 = scalar_lea.vmem %s240_s26, 2048  ;;  %p1583_p3 = scmp.lt.s32.totalorder %s240_s26, %s240_s26 }
  0x63   : > { %p1577_p11 = scmp.ne.s32.totalorder %s240_s26, %s1576_s12  ;;  %p1584_p12 = scmp.lt.s32.totalorder %s1576_s12, %s1576_s12 }
  0x65   : > { %p1578_p13 = pnand %p1577_p11, %p226_p4  ;;  %p1585_p0 = por %p1584_p12, %p1583_p3 }
  0x67   : > { %p1579_p2 = pneg %p1578_p13 }
  0x69   : > { %p1586_p6 = pnand %p1585_p0, %p1579_p2 }
  0x6b   : > { %1589 = shalt.err (!%p1586_p6)  }
  0x6c   : > { %1374 = dma.hbm_to_vmem [thread:$0]  (%p226_p4), %s1979_s1, 2048, %s240_s26, [#allocation4] }
  0x6d   : > { %1649 = dma.done.wait (%p226_p4), [#allocation4], 2048 }
  0x6e   : > { %1651 = vsyncadd (%p226_p4), [#allocation4], 4294965248  ;;  %v1450_v0 = vld [vmem:[%s1848_s25] sm:$0xff]   ;;  %v1451_v1 = vld [vmem:[%s1848_s25 + $0x8] sm:$0xff]   ;;  %p1934_p7 = scmp.eq.s32.totalorder %s1109_s21, 2 }
  0x6f   : > { %1304 = vmatprep.subr.bf16.mxu0 %v1450_v0  ;;  %v1452_v2 = vld [vmem:[%s1848_s25 + $0x10] sm:$0xff]   ;;  %v1453_v3 = vld [vmem:[%s1848_s25 + $0x18] sm:$0xff]   ;;  %v250_v4 = vld [vmem:[#allocation2] sm:$0xff] }
  0x70   : > { %1305 = vmatpush3.bf16.msra.mxu0 %v1450_v0  ;;  %1320 = vmatprep.mubr.bf16.mxu0 %v250_v4  ;;  %v1454_v5 = vld [vmem:[%s1848_s25 + $0x20] sm:$0xff]   ;;  %v1455_v6 = vld [vmem:[%s1848_s25 + $0x28] sm:$0xff]   ;;  %v1456_v7 = vld [vmem:[%s1848_s25 + $0x30] sm:$0xff]  }
  0x71   : > { %1306 = vmatprep.subr.bf16.mxu0 %v1451_v1  ;;  %v1457_v8 = vld [vmem:[%s1848_s25 + $0x38] sm:$0xff]   ;;  %v251_v9 = vld [vmem:[#allocation2 + $0x8] sm:$0xff]  ;;  %v252_v10 = vld [vmem:[#allocation2 + $0x10] sm:$0xff]  ;;  %s1687_s25 = smov [#allocation10]  }
  0x72   : > { %v253_v11 = vld [vmem:[#allocation2 + $0x18] sm:$0xff]  ;;  %v254_v12 = vld [vmem:[#allocation2 + $0x20] sm:$0xff]  ;;  %v255_v13 = vld [vmem:[#allocation2 + $0x28] sm:$0xff]  ;;  %s1014_s22 = sshll.u32 %s1687_s25, 4  ;;  %s1015_s22 = int_to_ptr.vmem [resolvable:$true] %s1014_s22 }
  0x73   : > { %v256_v14 = vld [vmem:[#allocation2 + $0x30] sm:$0xff]  ;;  %v257_v15 = vld [vmem:[#allocation2 + $0x38] sm:$0xff]  ;;  %v258_v16 = vld [vmem:[#allocation2 + $0x40] sm:$0xff]  ;;  %s1590_s26 = scalar_lea.vmem %s1015_s22, 4096  ;;  %p1597_p8 = scmp.lt.s32.totalorder %s1015_s22, %s1015_s22 }
  0x74   : > { %1307 = vmatpush3.bf16.msra.mxu0 %v1451_v1  ;;  %v259_v17 = vld [vmem:[#allocation2 + $0x48] sm:$0xff]  ;;  %v260_v18 = vld [vmem:[#allocation2 + $0x50] sm:$0xff]  ;;  %v261_v19 = vld [vmem:[#allocation2 + $0x58] sm:$0xff]  ;;  %p1591_p4 = scmp.ne.s32.totalorder %s1015_s22, %s1590_s26  ;;  %p1598_p9 = scmp.lt.s32.totalorder %s1590_s26, %s1590_s26 }
  0x75   : > { %1308 = vmatprep.subr.bf16.mxu0 %v1452_v2  ;;  %v262_v20 = vld [vmem:[#allocation2 + $0x60] sm:$0xff]  ;;  %v263_v21 = vld [vmem:[#allocation2 + $0x68] sm:$0xff]  ;;  %v264_v22 = vld [vmem:[#allocation2 + $0x70] sm:$0xff] }
  0x76   : > { %v265_v23 = vld [vmem:[#allocation2 + $0x78] sm:$0xff]  ;;  %v1460_v24 = vld [vmem:[#allocation5 + $0x44] ss:$8 sps:$4 sm:$0xff]   ;;  %p1592_p1 = pnand %p1591_p4, %p1934_p7  ;;  %p1599_p10 = por %p1598_p9, %p1597_p8 }
  0x77   : > { %808 = vmatprep.mubr.bf16.mxu1 %v1460_v24  ;;  %v1484_v25 = vld [vmem:[#allocation5 + $0x4] ss:$8 sps:$4 sm:$0xff]  }
  0x78   : > { %1309 = vmatpush3.bf16.msra.mxu0 %v1452_v2  ;;  %v1470_v24 = vld [vmem:[#allocation5 + $0x84] ss:$8 sps:$4 sm:$0xff]   ;;  %p1593_p5 = pneg %p1592_p1 }
  0x79   : > { %1310 = vmatprep.subr.bf16.mxu0 %v1453_v3 }
  0x7a   : > { %p1600_p11 = pnand %p1599_p10, %p1593_p5 }
  0x7c   : > { %1311 = vmatpush3.bf16.msra.mxu0 %v1453_v3 }
  0x7d   : > { %1312 = vmatprep.subr.bf16.mxu0 %v1454_v5 }
  0x80   : > { %1313 = vmatpush3.bf16.msra.mxu0 %v1454_v5 }
  0x81   : > { %1314 = vmatprep.subr.bf16.mxu0 %v1455_v6 }
  0x84   : > { %1315 = vmatpush3.bf16.msra.mxu0 %v1455_v6 }
  0x85   : > { %1316 = vmatprep.subr.bf16.mxu0 %v1456_v7 }
  0x88   : > { %1317 = vmatpush3.bf16.msra.mxu0 %v1456_v7 }
  0x89   : > { %1318 = vmatprep.subr.bf16.mxu0 %v1457_v8 }
  0x8c   : > { %1319 = vmatpush3.bf16.msra.mxu0 %v1457_v8 }
  0x8f   : > { %1321 = vmatmul.mubr.bf16.vlgmr.msra.gmra.mrb[0].mxu0 %v251_v9 }
  0x90   : > { %1324 = vmatprep.mubr.bf16.mxu0 %v252_v10  ;;  %v1458_v10 = vld [vmem:[#allocation5 + $0x40] ss:$8 sps:$4 sm:$0xff]  }
  0x97   : > { %1325 = vmatmul.mubr.bf16.gmra.mrb[4].mxu0 %v253_v11  ;;  %v1482_v11 = vld [vmem:[#allocation5] ss:$8 sps:$4 sm:$0xff]  }
  0x98   : > { %1328 = vmatprep.mubr.bf16.mxu0 %v254_v12  ;;  %v1461_v12 = vld [vmem:[#allocation5 + $0x54] ss:$8 sps:$4 sm:$0xff]  }
  0x9f   : > { %1329 = vmatmul.mubr.bf16.gmra.mrb[8].mxu0 %v255_v13  ;;  %v1488_v13 = vld [vmem:[#allocation5 + $0x14] ss:$8 sps:$4 sm:$0xff]  }
  0xa0   : > { %1332 = vmatprep.mubr.bf16.mxu0 %v256_v14  ;;  %v1463_v14 = vld [vmem:[#allocation5 + $0x50] ss:$8 sps:$4 sm:$0xff]  }
  0xa7   : > { %1333 = vmatmul.mubr.bf16.gmra.mrb[12].mxu0 %v257_v15  ;;  %v1490_v15 = vld [vmem:[#allocation5 + $0x10] ss:$8 sps:$4 sm:$0xff]  }
  0xa8   : > { %1336 = vmatprep.mubr.bf16.mxu0 %v258_v16  ;;  %v1464_v16 = vld [vmem:[#allocation5 + $0x64] ss:$8 sps:$4 sm:$0xff]  }
  0xaf   : > { %1337 = vmatmul.mubr.bf16.gmra.mrb[16].mxu0 %v259_v17  ;;  %v1494_v17 = vld [vmem:[#allocation5 + $0x24] ss:$8 sps:$4 sm:$0xff]  }
  0xb0   : > { %1340 = vmatprep.mubr.bf16.mxu0 %v260_v18  ;;  %v1466_v18 = vld [vmem:[#allocation5 + $0x60] ss:$8 sps:$4 sm:$0xff]  }
  0xb7   : > { %1341 = vmatmul.mubr.bf16.gmra.mrb[20].mxu0 %v261_v19  ;;  %v1496_v19 = vld [vmem:[#allocation5 + $0x20] ss:$8 sps:$4 sm:$0xff]  }
  0xb8   : > { %1344 = vmatprep.mubr.bf16.mxu0 %v262_v20  ;;  %v1467_v20 = vld [vmem:[#allocation5 + $0x74] ss:$8 sps:$4 sm:$0xff]  }
  0xbf   : > { %1345 = vmatmul.mubr.bf16.gmra.mrb[24].mxu0 %v263_v21  ;;  %v1500_v21 = vld [vmem:[#allocation5 + $0x34] ss:$8 sps:$4 sm:$0xff]  }
  0xc0   : > { %1348 = vmatprep.mubr.bf16.mxu0 %v264_v22  ;;  %v1469_v22 = vld [vmem:[#allocation5 + $0x70] ss:$8 sps:$4 sm:$0xff]  }
  0xc7   : > { %1349 = vmatmul.mubr.bf16.gmra.mrb[28].mxu0 %v265_v23  ;;  %v1502_v23 = vld [vmem:[#allocation5 + $0x30] ss:$8 sps:$4 sm:$0xff]  }
  0xc8   : > { %776 = vmatprep.mubr.bf16.mxu0 %v1484_v25  ;;  %v1472_v25 = vld [vmem:[#allocation5 + $0x80] ss:$8 sps:$4 sm:$0xff]  }
 0x162   : > { %v1322_v26 = vpop.f32.mrb[0].mxu0 }
 0x163   : > { %v364_v27 = vpop.f32.mrb[1].mxu0 }
 0x164   : > { %v1323_v28 = vpop.f32.mrb[2].mxu0 }
 0x165   : > { %v492_v29 = vpack.c.bf16 %v1323_v28, %v1322_v26  ;;  %v367_v30 = vpop.f32.mrb[3].mxu0  ;;  %v1473_v26 = vld [vmem:[#allocation5 + $0x94] ss:$8 sps:$4 sm:$0xff]   ;;  %v1476_v28 = vld [vmem:[#allocation5 + $0xa4] ss:$8 sps:$4 sm:$0xff]  }
 0x166   : > { %v491_v31 = vpack.c.bf16 %v367_v30, %v364_v27  ;;  %v1475_v27 = vld [vmem:[#allocation5 + $0x90] ss:$8 sps:$4 sm:$0xff]   ;;  %v1479_v30 = vld [vmem:[#allocation5 + $0xb4] ss:$8 sps:$4 sm:$0xff]  }
 0x16a   : > { %v1326_v32 = vpop.f32.mrb[4].mxu0 }
 0x16b   : > { %v380_v33 = vpop.f32.mrb[5].mxu0 }
 0x16c   : > { %v1327_v34 = vpop.f32.mrb[6].mxu0 }
 0x16d   : > { %v494_v35 = vpack.c.bf16 %v1327_v34, %v1326_v32  ;;  %v383_v36 = vpop.f32.mrb[7].mxu0  ;;  %v1485_v32 = vld [vmem:[#allocation5 + $0xc4] ss:$8 sps:$4 sm:$0xff]   ;;  %v1491_v34 = vld [vmem:[#allocation5 + $0xd4] ss:$8 sps:$4 sm:$0xff]  }
 0x16e   : > { %v493_v37 = vpack.c.bf16 %v383_v36, %v380_v33  ;;  %v1487_v33 = vld [vmem:[#allocation5 + $0xc0] ss:$8 sps:$4 sm:$0xff]   ;;  %v1497_v36 = vld [vmem:[#allocation5 + $0xe4] ss:$8 sps:$4 sm:$0xff]  }
 0x172   : > { %v1330_v38 = vpop.f32.mrb[8].mxu0 }
 0x173   : > { %v396_v39 = vpop.f32.mrb[9].mxu0 }
 0x174   : > { %v1331_v40 = vpop.f32.mrb[10].mxu0 }
 0x175   : > { %v496_v41 = vpack.c.bf16 %v1331_v40, %v1330_v38  ;;  %v399_v42 = vpop.f32.mrb[11].mxu0  ;;  %v1503_v38 = vld [vmem:[#allocation5 + $0xf4] ss:$8 sps:$4 sm:$0xff]  }
 0x176   : > { %v495_v43 = vpack.c.bf16 %v399_v42, %v396_v39  ;;  %v1505_v39 = vld [vmem:[#allocation5 + $0xf0] ss:$8 sps:$4 sm:$0xff]   ;;  %v1898_v42 = vld [vmem:[%s223_s11] ss:$0 sm:$0xff] }
 0x17a   : > { %v1334_v44 = vpop.f32.mrb[12].mxu0 }
 0x17b   : > { %v412_v45 = vpop.f32.mrb[13].mxu0 }
 0x17c   : > { %v1335_v46 = vpop.f32.mrb[14].mxu0 }
 0x17d   : > { %v498_v47 = vpack.c.bf16 %v1335_v46, %v1334_v44  ;;  %v415_v48 = vpop.f32.mrb[15].mxu0 }
 0x17e   : > { %v497_v49 = vpack.c.bf16 %v415_v48, %v412_v45 }
 0x182   : > { %v1338_v50 = vpop.f32.mrb[16].mxu0 }
 0x183   : > { %v428_v51 = vpop.f32.mrb[17].mxu0 }
 0x184   : > { %v1339_v52 = vpop.f32.mrb[18].mxu0 }
 0x185   : > { %v500_v53 = vpack.c.bf16 %v1339_v52, %v1338_v50  ;;  %v431_v54 = vpop.f32.mrb[19].mxu0 }
 0x186   : > { %v499_v55 = vpack.c.bf16 %v431_v54, %v428_v51 }
 0x188   : > { %1192 = vmatprep.subr.bf16.mxu0 %v499_v55  ;;  %1352 = vmatprep.subr.bf16.mxu1 %v499_v55 }
 0x189   : > { %1193 = vmatpush3.bf16.msra.mxu0 %v491_v31  ;;  %1360 = vmatpush3.bf16.msra.mxu1 %v491_v31  ;;  %v1481_v31 = vld [vmem:[#allocation5 + $0xb0] ss:$8 sps:$4 sm:$0xff]  }
 0x18a   : > { %v1342_v56 = vpop.f32.mrb[20].mxu0  ;;  %1194 = vmatprep.subr.bf16.mxu0 %v500_v53  ;;  %1353 = vmatprep.subr.bf16.mxu1 %v500_v53 }
 0x18b   : > { %v444_v57 = vpop.f32.mrb[21].mxu0 }
 0x18c   : > { %v1343_v58 = vpop.f32.mrb[22].mxu0 }
 0x18d   : > { %v502_v59 = vpack.c.bf16 %v1343_v58, %v1342_v56  ;;  %v447_v60 = vpop.f32.mrb[23].mxu0  ;;  %1195 = vmatpush3.bf16.msra.mxu0 %v492_v29  ;;  %1361 = vmatpush3.bf16.msra.mxu1 %v492_v29  ;;  %v1478_v29 = vld [vmem:[#allocation5 + $0xa0] ss:$8 sps:$4 sm:$0xff]  }
 0x18e   : > { %v501_v61 = vpack.c.bf16 %v447_v60, %v444_v57 }
 0x190   : > { %1196 = vmatprep.subr.bf16.mxu0 %v501_v61  ;;  %1354 = vmatprep.subr.bf16.mxu1 %v501_v61 }
 0x191   : > { %1197 = vmatpush3.bf16.msra.mxu0 %v493_v37  ;;  %1362 = vmatpush3.bf16.msra.mxu1 %v493_v37  ;;  %v1499_v37 = vld [vmem:[#allocation5 + $0xe0] ss:$8 sps:$4 sm:$0xff]  }
 0x192   : > { %v1346_v62 = vpop.f32.mrb[24].mxu0  ;;  %1198 = vmatprep.subr.bf16.mxu0 %v502_v59  ;;  %1355 = vmatprep.subr.bf16.mxu1 %v502_v59 }
 0x193   : > { %v460_v63 = vpop.f32.mrb[25].mxu0 }
 0x194   : > { %v1347_v0 = vpop.f32.mrb[26].mxu0 }
 0x195   : > { %v504_v1 = vpack.c.bf16 %v1347_v0, %v1346_v62  ;;  %v463_v2 = vpop.f32.mrb[27].mxu0  ;;  %1199 = vmatpush3.bf16.msra.mxu0 %v494_v35  ;;  %1363 = vmatpush3.bf16.msra.mxu1 %v494_v35  ;;  %v1493_v35 = vld [vmem:[#allocation5 + $0xd0] ss:$8 sps:$4 sm:$0xff]  }
 0x196   : > { %v503_v3 = vpack.c.bf16 %v463_v2, %v460_v63 }
 0x198   : > { %1200 = vmatprep.subr.bf16.mxu0 %v503_v3  ;;  %1356 = vmatprep.subr.bf16.mxu1 %v503_v3 }
 0x199   : > { %1201 = vmatpush3.bf16.msra.mxu0 %v495_v43  ;;  %1364 = vmatpush3.bf16.msra.mxu1 %v495_v43 }
 0x19a   : > { %v1350_v4 = vpop.f32.mrb[28].mxu0  ;;  %1202 = vmatprep.subr.bf16.mxu0 %v504_v1  ;;  %1357 = vmatprep.subr.bf16.mxu1 %v504_v1 }
 0x19b   : > { %v476_v5 = vpop.f32.mrb[29].mxu0 }
 0x19c   : > { %v1351_v6 = vpop.f32.mrb[30].mxu0 }
 0x19d   : > { %v506_v7 = vpack.c.bf16 %v1351_v6, %v1350_v4  ;;  %v479_v8 = vpop.f32.mrb[31].mxu0  ;;  %1203 = vmatpush3.bf16.msra.mxu0 %v496_v41  ;;  %1365 = vmatpush3.bf16.msra.mxu1 %v496_v41 }
 0x19e   : > { %v505_v9 = vpack.c.bf16 %v479_v8, %v476_v5 }
 0x1a0   : > { %1204 = vmatprep.subr.bf16.mxu0 %v505_v9  ;;  %1358 = vmatprep.subr.bf16.mxu1 %v505_v9 }
 0x1a1   : > { %1205 = vmatpush3.bf16.msra.mxu0 %v497_v49  ;;  %1366 = vmatpush3.bf16.msra.mxu1 %v497_v49 }
 0x1a2   : > { %1206 = vmatprep.subr.bf16.mxu0 %v506_v7  ;;  %1359 = vmatprep.subr.bf16.mxu1 %v506_v7 }
 0x1a5   : > { %1207 = vmatpush3.bf16.msra.mxu0 %v498_v47  ;;  %1367 = vmatpush3.bf16.msra.mxu1 %v498_v47 }
 0x1a8   : > { %809 = vmatmul.mubr.bf16.vlgmr.msra.gmra.mrb[0].mxu1 %v1458_v10  ;;  %777 = vmatmul.mubr.bf16.vlgmr.msra.gmra.mrb[32].mxu0 %v1482_v11 }
 0x1a9   : > { %816 = vmatprep.mubr.bf16.mxu1 %v1461_v12  ;;  %784 = vmatprep.mubr.bf16.mxu0 %v1488_v13 }
 0x1b0   : > { %817 = vmatmul.mubr.bf16.gmra.mrb[4].mxu1 %v1463_v14  ;;  %785 = vmatmul.mubr.bf16.gmra.mrb[36].mxu0 %v1490_v15 }
 0x1b1   : > { %824 = vmatprep.mubr.bf16.mxu1 %v1464_v16  ;;  %792 = vmatprep.mubr.bf16.mxu0 %v1494_v17 }
 0x1b8   : > { %825 = vmatmul.mubr.bf16.gmra.mrb[8].mxu1 %v1466_v18  ;;  %793 = vmatmul.mubr.bf16.gmra.mrb[40].mxu0 %v1496_v19 }
 0x1b9   : > { %832 = vmatprep.mubr.bf16.mxu1 %v1467_v20  ;;  %800 = vmatprep.mubr.bf16.mxu0 %v1500_v21 }
 0x1c0   : > { %833 = vmatmul.mubr.bf16.gmra.mrb[12].mxu1 %v1469_v22  ;;  %801 = vmatmul.mubr.bf16.gmra.mrb[44].mxu0 %v1502_v23 }
 0x1c1   : > { %840 = vmatprep.mubr.bf16.mxu1 %v1470_v24 }
 0x1c8   : > { %841 = vmatmul.mubr.bf16.gmra.mrb[16].mxu1 %v1472_v25 }
 0x1c9   : > { %848 = vmatprep.mubr.bf16.mxu1 %v1473_v26 }
 0x1d0   : > { %849 = vmatmul.mubr.bf16.gmra.mrb[20].mxu1 %v1475_v27 }
 0x1d1   : > { %856 = vmatprep.mubr.bf16.mxu1 %v1476_v28 }
 0x1d8   : > { %857 = vmatmul.mubr.bf16.gmra.mrb[24].mxu1 %v1478_v29 }
 0x1d9   : > { %864 = vmatprep.mubr.bf16.mxu1 %v1479_v30 }
 0x1e0   : > { %865 = vmatmul.mubr.bf16.gmra.mrb[28].mxu1 %v1481_v31 }
 0x1e1   : > { %872 = vmatprep.mubr.bf16.mxu1 %v1485_v32 }
 0x1e8   : > { %873 = vmatmul.mubr.bf16.gmra.mrb[32].mxu1 %v1487_v33 }
 0x1e9   : > { %880 = vmatprep.mubr.bf16.mxu1 %v1491_v34 }
 0x1f0   : > { %881 = vmatmul.mubr.bf16.gmra.mrb[36].mxu1 %v1493_v35 }
 0x1f1   : > { %888 = vmatprep.mubr.bf16.mxu1 %v1497_v36 }
 0x1f8   : > { %889 = vmatmul.mubr.bf16.gmra.mrb[40].mxu1 %v1499_v37 }
 0x1f9   : > { %896 = vmatprep.mubr.bf16.mxu1 %v1503_v38 }
 0x200   : > { %897 = vmatmul.mubr.bf16.gmra.mrb[44].mxu1 %v1505_v39 }
 0x27b   : > { %v1232_v40 = vpop.f32.mrb[0].mxu1  ;;  %v1208_v41 = vpop.f32.mrb[32].mxu0 }
 0x27c   : > { %v1233_v43 = vpop.f32.mrb[1].mxu1  ;;  %v1209_v44 = vpop.f32.mrb[33].mxu0 }
 0x27d   : > { %v1234_v45 = vadd.f32 %v1233_v43, %v1232_v40  ;;  %v1235_v46 = vpop.f32.mrb[2].mxu1  ;;  %v1210_v47 = vadd.f32 %v1209_v44, %v1208_v41  ;;  %v1211_v48 = vpop.f32.mrb[34].mxu0 }
 0x27e   : > { %v1236_v49 = vpop.f32.mrb[3].mxu1  ;;  %v1212_v50 = vpop.f32.mrb[35].mxu0 }
 0x27f   : > { %v811_v51 = vadd.f32 %v1234_v45, %v1898_v42  ;;  %v1237_v52 = vadd.f32 %v1236_v49, %v1235_v46  ;;  %v779_v53 = vadd.f32 %v1210_v47, %v1898_v42  ;;  %v1213_v54 = vadd.f32 %v1212_v50, %v1211_v48 }
 0x281   : > { %v913_v55 = vmax.f32 %v811_v51, 0.0  ;;  %v814_v56 = vadd.f32 %v1237_v52, %v1898_v42  ;;  %v905_v57 = vmax.f32 %v779_v53, 0.0  ;;  %v782_v58 = vadd.f32 %v1213_v54, %v1898_v42 }
 0x283   : > { %981 = vst [vmem:[#allocation10 + $0x40] sm:$0xff] %v913_v55  ;;  %v914_v59 = vmax.f32 %v814_v56, 0.0  ;;  %v1238_v60 = vpop.f32.mrb[4].mxu1  ;;  %973 = vst [vmem:[#allocation10] sm:$0xff] %v905_v57  ;;  %v906_v61 = vmax.f32 %v782_v58, 0.0  ;;  %v1214_v62 = vpop.f32.mrb[36].mxu0 }
 0x284   : > { %v1239_v63 = vpop.f32.mrb[5].mxu1  ;;  %v1215_v0 = vpop.f32.mrb[37].mxu0 }
 0x285   : > { %v941_v1 = vpack.c.bf16 %v914_v59, %v913_v55  ;;  %982 = vst [vmem:[#allocation10 + $0x48] sm:$0xff] %v914_v59  ;;  %v1240_v2 = vadd.f32 %v1239_v63, %v1238_v60  ;;  %v1241_v3 = vpop.f32.mrb[6].mxu1  ;;  %v937_v4 = vpack.c.bf16 %v906_v61, %v905_v57  ;;  %974 = vst [vmem:[#allocation10 + $0x8] sm:$0xff] %v906_v61  ;;  %v1217_v6 = vpop.f32.mrb[38].mxu0 }
 0x286   : > { %v1216_v5 = vadd.f32 %v1215_v0, %v1214_v62  ;;  %v1242_v7 = vpop.f32.mrb[7].mxu1  ;;  %v1218_v8 = vpop.f32.mrb[39].mxu0 }
 0x287   : > { %961 = vst [vmem:[#allocation2 + $0x20] sm:$0xff] %v941_v1  ;;  %v819_v9 = vadd.f32 %v1240_v2, %v1898_v42  ;;  %v1243_v10 = vadd.f32 %v1242_v7, %v1241_v3  ;;  %957 = vst [vmem:[#allocation2] sm:$0xff] %v937_v4  ;;  %v1219_v12 = vadd.f32 %v1218_v8, %v1217_v6 }
 0x288   : > { %v787_v11 = vadd.f32 %v1216_v5, %v1898_v42 }
 0x289   : > { %v915_v13 = vmax.f32 %v819_v9, 0.0  ;;  %v822_v14 = vadd.f32 %v1243_v10, %v1898_v42  ;;  %v790_v16 = vadd.f32 %v1219_v12, %v1898_v42 }
 0x28a   : > { %v907_v15 = vmax.f32 %v787_v11, 0.0 }
 0x28b   : > { %983 = vst [vmem:[#allocation10 + $0x50] sm:$0xff] %v915_v13  ;;  %v916_v17 = vmax.f32 %v822_v14, 0.0  ;;  %v1244_v18 = vpop.f32.mrb[8].mxu1  ;;  %v908_v19 = vmax.f32 %v790_v16, 0.0  ;;  %v1220_v20 = vpop.f32.mrb[40].mxu0 }
 0x28c   : > { %975 = vst [vmem:[#allocation10 + $0x10] sm:$0xff] %v907_v15  ;;  %v1245_v21 = vpop.f32.mrb[9].mxu1  ;;  %v1221_v22 = vpop.f32.mrb[41].mxu0 }
 0x28d   : > { %v942_v23 = vpack.c.bf16 %v916_v17, %v915_v13  ;;  %984 = vst [vmem:[#allocation10 + $0x58] sm:$0xff] %v916_v17  ;;  %v1246_v24 = vadd.f32 %v1245_v21, %v1244_v18  ;;  %v1247_v25 = vpop.f32.mrb[10].mxu1  ;;  %v938_v26 = vpack.c.bf16 %v908_v19, %v907_v15  ;;  %976 = vst [vmem:[#allocation10 + $0x18] sm:$0xff] %v908_v19  ;;  %v1223_v28 = vpop.f32.mrb[42].mxu0 }
 0x28e   : > { %v1222_v27 = vadd.f32 %v1221_v22, %v1220_v20  ;;  %v1248_v29 = vpop.f32.mrb[11].mxu1  ;;  %v1224_v30 = vpop.f32.mrb[43].mxu0 }
 0x28f   : > { %962 = vst [vmem:[#allocation2 + $0x28] sm:$0xff] %v942_v23  ;;  %v827_v31 = vadd.f32 %v1246_v24, %v1898_v42  ;;  %v1249_v32 = vadd.f32 %v1248_v29, %v1247_v25  ;;  %958 = vst [vmem:[#allocation2 + $0x8] sm:$0xff] %v938_v26  ;;  %v1225_v34 = vadd.f32 %v1224_v30, %v1223_v28 }
 0x290   : > { %v795_v33 = vadd.f32 %v1222_v27, %v1898_v42 }
 0x291   : > { %v917_v35 = vmax.f32 %v827_v31, 0.0  ;;  %v830_v36 = vadd.f32 %v1249_v32, %v1898_v42  ;;  %v798_v38 = vadd.f32 %v1225_v34, %v1898_v42 }
 0x292   : > { %v909_v37 = vmax.f32 %v795_v33, 0.0 }
 0x293   : > { %985 = vst [vmem:[#allocation10 + $0x60] sm:$0xff] %v917_v35  ;;  %v918_v39 = vmax.f32 %v830_v36, 0.0  ;;  %v1250_v40 = vpop.f32.mrb[12].mxu1  ;;  %v910_v41 = vmax.f32 %v798_v38, 0.0  ;;  %v1226_v43 = vpop.f32.mrb[44].mxu0 }
 0x294   : > { %977 = vst [vmem:[#allocation10 + $0x20] sm:$0xff] %v909_v37  ;;  %v1251_v44 = vpop.f32.mrb[13].mxu1  ;;  %v1227_v45 = vpop.f32.mrb[45].mxu0 }
 0x295   : > { %v943_v46 = vpack.c.bf16 %v918_v39, %v917_v35  ;;  %986 = vst [vmem:[#allocation10 + $0x68] sm:$0xff] %v918_v39  ;;  %v1252_v47 = vadd.f32 %v1251_v44, %v1250_v40  ;;  %v1253_v48 = vpop.f32.mrb[14].mxu1  ;;  %v939_v49 = vpack.c.bf16 %v910_v41, %v909_v37  ;;  %978 = vst [vmem:[#allocation10 + $0x28] sm:$0xff] %v910_v41  ;;  %v1229_v51 = vpop.f32.mrb[46].mxu0 }
 0x296   : > { %v1228_v50 = vadd.f32 %v1227_v45, %v1226_v43  ;;  %v1254_v52 = vpop.f32.mrb[15].mxu1  ;;  %v1230_v53 = vpop.f32.mrb[47].mxu0 }
 0x297   : > { %963 = vst [vmem:[#allocation2 + $0x30] sm:$0xff] %v943_v46  ;;  %v835_v54 = vadd.f32 %v1252_v47, %v1898_v42  ;;  %v1255_v55 = vadd.f32 %v1254_v52, %v1253_v48  ;;  %959 = vst [vmem:[#allocation2 + $0x10] sm:$0xff] %v939_v49  ;;  %v1231_v57 = vadd.f32 %v1230_v53, %v1229_v51 }
 0x298   : > { %v803_v56 = vadd.f32 %v1228_v50, %v1898_v42 }
 0x299   : > { %v919_v58 = vmax.f32 %v835_v54, 0.0  ;;  %v838_v59 = vadd.f32 %v1255_v55, %v1898_v42  ;;  %v806_v61 = vadd.f32 %v1231_v57, %v1898_v42 }
 0x29a   : > { %v911_v60 = vmax.f32 %v803_v56, 0.0 }
 0x29b   : > { %987 = vst [vmem:[#allocation10 + $0x70] sm:$0xff] %v919_v58  ;;  %v920_v62 = vmax.f32 %v838_v59, 0.0  ;;  %v1256_v63 = vpop.f32.mrb[16].mxu1  ;;  %v912_v0 = vmax.f32 %v806_v61, 0.0 }
 0x29c   : > { %979 = vst [vmem:[#allocation10 + $0x30] sm:$0xff] %v911_v60  ;;  %v1257_v1 = vpop.f32.mrb[17].mxu1 }
 0x29d   : > { %v944_v2 = vpack.c.bf16 %v920_v62, %v919_v58  ;;  %988 = vst [vmem:[#allocation10 + $0x78] sm:$0xff] %v920_v62  ;;  %v1258_v3 = vadd.f32 %v1257_v1, %v1256_v63  ;;  %v1259_v4 = vpop.f32.mrb[18].mxu1  ;;  %v940_v5 = vpack.c.bf16 %v912_v0, %v911_v60  ;;  %980 = vst [vmem:[#allocation10 + $0x38] sm:$0xff] %v912_v0 }
 0x29e   : > { %v1260_v6 = vpop.f32.mrb[19].mxu1 }
 0x29f   : > { %964 = vst [vmem:[#allocation2 + $0x38] sm:$0xff] %v944_v2  ;;  %v843_v7 = vadd.f32 %v1258_v3, %v1898_v42  ;;  %v1261_v8 = vadd.f32 %v1260_v6, %v1259_v4  ;;  %960 = vst [vmem:[#allocation2 + $0x18] sm:$0xff] %v940_v5 }
 0x2a1   : > { %v921_v9 = vmax.f32 %v843_v7, 0.0  ;;  %v846_v10 = vadd.f32 %v1261_v8, %v1898_v42 }
 0x2a3   : > { %989 = vst [vmem:[#allocation10 + $0x80] sm:$0xff] %v921_v9  ;;  %v922_v11 = vmax.f32 %v846_v10, 0.0  ;;  %v1262_v12 = vpop.f32.mrb[20].mxu1 }
 0x2a4   : > { %v1263_v13 = vpop.f32.mrb[21].mxu1 }
 0x2a5   : > { %v945_v14 = vpack.c.bf16 %v922_v11, %v921_v9  ;;  %990 = vst [vmem:[#allocation10 + $0x88] sm:$0xff] %v922_v11  ;;  %v1264_v15 = vadd.f32 %v1263_v13, %v1262_v12  ;;  %v1265_v16 = vpop.f32.mrb[22].mxu1 }
 0x2a6   : > { %v1266_v17 = vpop.f32.mrb[23].mxu1 }
 0x2a7   : > { %965 = vst [vmem:[#allocation2 + $0x40] sm:$0xff] %v945_v14  ;;  %v851_v18 = vadd.f32 %v1264_v15, %v1898_v42  ;;  %v1267_v19 = vadd.f32 %v1266_v17, %v1265_v16 }
 0x2a9   : > { %v923_v20 = vmax.f32 %v851_v18, 0.0  ;;  %v854_v21 = vadd.f32 %v1267_v19, %v1898_v42 }
 0x2ab   : > { %991 = vst [vmem:[#allocation10 + $0x90] sm:$0xff] %v923_v20  ;;  %v924_v22 = vmax.f32 %v854_v21, 0.0  ;;  %v1268_v23 = vpop.f32.mrb[24].mxu1 }
 0x2ac   : > { %v1269_v24 = vpop.f32.mrb[25].mxu1 }
 0x2ad   : > { %v946_v25 = vpack.c.bf16 %v924_v22, %v923_v20  ;;  %992 = vst [vmem:[#allocation10 + $0x98] sm:$0xff] %v924_v22  ;;  %v1270_v26 = vadd.f32 %v1269_v24, %v1268_v23  ;;  %v1271_v27 = vpop.f32.mrb[26].mxu1 }
 0x2ae   : > { %v1272_v28 = vpop.f32.mrb[27].mxu1 }
 0x2af   : > { %966 = vst [vmem:[#allocation2 + $0x48] sm:$0xff] %v946_v25  ;;  %v859_v29 = vadd.f32 %v1270_v26, %v1898_v42  ;;  %v1273_v30 = vadd.f32 %v1272_v28, %v1271_v27 }
 0x2b1   : > { %v925_v31 = vmax.f32 %v859_v29, 0.0  ;;  %v862_v32 = vadd.f32 %v1273_v30, %v1898_v42 }
 0x2b3   : > { %993 = vst [vmem:[#allocation10 + $0xa0] sm:$0xff] %v925_v31  ;;  %v926_v33 = vmax.f32 %v862_v32, 0.0  ;;  %v1274_v34 = vpop.f32.mrb[28].mxu1 }
 0x2b4   : > { %v1275_v35 = vpop.f32.mrb[29].mxu1 }
 0x2b5   : > { %v947_v36 = vpack.c.bf16 %v926_v33, %v925_v31  ;;  %994 = vst [vmem:[#allocation10 + $0xa8] sm:$0xff] %v926_v33  ;;  %v1276_v37 = vadd.f32 %v1275_v35, %v1274_v34  ;;  %v1277_v38 = vpop.f32.mrb[30].mxu1 }
 0x2b6   : > { %v1278_v39 = vpop.f32.mrb[31].mxu1 }
 0x2b7   : > { %967 = vst [vmem:[#allocation2 + $0x50] sm:$0xff] %v947_v36  ;;  %v867_v40 = vadd.f32 %v1276_v37, %v1898_v42  ;;  %v1279_v41 = vadd.f32 %v1278_v39, %v1277_v38 }
 0x2b9   : > { %v927_v43 = vmax.f32 %v867_v40, 0.0  ;;  %v870_v44 = vadd.f32 %v1279_v41, %v1898_v42 }
 0x2bb   : > { %995 = vst [vmem:[#allocation10 + $0xb0] sm:$0xff] %v927_v43  ;;  %v928_v45 = vmax.f32 %v870_v44, 0.0  ;;  %v1280_v46 = vpop.f32.mrb[32].mxu1 }
 0x2bc   : > { %v1281_v47 = vpop.f32.mrb[33].mxu1 }
 0x2bd   : > { %v948_v48 = vpack.c.bf16 %v928_v45, %v927_v43  ;;  %996 = vst [vmem:[#allocation10 + $0xb8] sm:$0xff] %v928_v45  ;;  %v1282_v49 = vadd.f32 %v1281_v47, %v1280_v46  ;;  %v1283_v50 = vpop.f32.mrb[34].mxu1 }
 0x2be   : > { %v1284_v51 = vpop.f32.mrb[35].mxu1 }
 0x2bf   : > { %968 = vst [vmem:[#allocation2 + $0x58] sm:$0xff] %v948_v48  ;;  %v875_v52 = vadd.f32 %v1282_v49, %v1898_v42  ;;  %v1285_v53 = vadd.f32 %v1284_v51, %v1283_v50 }
 0x2c1   : > { %v929_v54 = vmax.f32 %v875_v52, 0.0  ;;  %v878_v55 = vadd.f32 %v1285_v53, %v1898_v42 }
 0x2c3   : > { %997 = vst [vmem:[#allocation10 + $0xc0] sm:$0xff] %v929_v54  ;;  %v930_v56 = vmax.f32 %v878_v55, 0.0  ;;  %v1286_v57 = vpop.f32.mrb[36].mxu1 }
 0x2c4   : > { %v1287_v58 = vpop.f32.mrb[37].mxu1 }
 0x2c5   : > { %v949_v59 = vpack.c.bf16 %v930_v56, %v929_v54  ;;  %998 = vst [vmem:[#allocation10 + $0xc8] sm:$0xff] %v930_v56  ;;  %v1288_v60 = vadd.f32 %v1287_v58, %v1286_v57  ;;  %v1289_v61 = vpop.f32.mrb[38].mxu1 }
 0x2c6   : > { %v1290_v62 = vpop.f32.mrb[39].mxu1 }
 0x2c7   : > { %969 = vst [vmem:[#allocation2 + $0x60] sm:$0xff] %v949_v59  ;;  %v883_v63 = vadd.f32 %v1288_v60, %v1898_v42  ;;  %v1291_v0 = vadd.f32 %v1290_v62, %v1289_v61 }
 0x2c9   : > { %v931_v1 = vmax.f32 %v883_v63, 0.0  ;;  %v886_v2 = vadd.f32 %v1291_v0, %v1898_v42 }
 0x2cb   : > { %999 = vst [vmem:[#allocation10 + $0xd0] sm:$0xff] %v931_v1  ;;  %v932_v3 = vmax.f32 %v886_v2, 0.0  ;;  %v1292_v4 = vpop.f32.mrb[40].mxu1 }
 0x2cc   : > { %v1293_v5 = vpop.f32.mrb[41].mxu1 }
 0x2cd   : > { %v950_v6 = vpack.c.bf16 %v932_v3, %v931_v1  ;;  %1000 = vst [vmem:[#allocation10 + $0xd8] sm:$0xff] %v932_v3  ;;  %v1294_v7 = vadd.f32 %v1293_v5, %v1292_v4  ;;  %v1295_v8 = vpop.f32.mrb[42].mxu1 }
 0x2ce   : > { %v1296_v9 = vpop.f32.mrb[43].mxu1 }
 0x2cf   : > { %970 = vst [vmem:[#allocation2 + $0x68] sm:$0xff] %v950_v6  ;;  %v891_v10 = vadd.f32 %v1294_v7, %v1898_v42  ;;  %v1297_v11 = vadd.f32 %v1296_v9, %v1295_v8 }
 0x2d1   : > { %v933_v12 = vmax.f32 %v891_v10, 0.0  ;;  %v894_v13 = vadd.f32 %v1297_v11, %v1898_v42 }
 0x2d3   : > { %1001 = vst [vmem:[#allocation10 + $0xe0] sm:$0xff] %v933_v12  ;;  %v934_v14 = vmax.f32 %v894_v13, 0.0  ;;  %v1298_v15 = vpop.f32.mrb[44].mxu1 }
 0x2d4   : > { %v1299_v16 = vpop.f32.mrb[45].mxu1 }
 0x2d5   : > { %v951_v17 = vpack.c.bf16 %v934_v14, %v933_v12  ;;  %1002 = vst [vmem:[#allocation10 + $0xe8] sm:$0xff] %v934_v14  ;;  %v1300_v18 = vadd.f32 %v1299_v16, %v1298_v15  ;;  %v1301_v19 = vpop.f32.mrb[46].mxu1 }
 0x2d6   : > { %v1302_v20 = vpop.f32.mrb[47].mxu1 }
 0x2d7   : > { %971 = vst [vmem:[#allocation2 + $0x70] sm:$0xff] %v951_v17  ;;  %v899_v21 = vadd.f32 %v1300_v18, %v1898_v42  ;;  %v1303_v22 = vadd.f32 %v1302_v20, %v1301_v19 }
 0x2d9   : > { %v935_v23 = vmax.f32 %v899_v21, 0.0  ;;  %v902_v24 = vadd.f32 %v1303_v22, %v1898_v42 }
 0x2db   : > { %1003 = vst [vmem:[#allocation10 + $0xf0] sm:$0xff] %v935_v23  ;;  %v936_v25 = vmax.f32 %v902_v24, 0.0 }
 0x2dd   : > { %v952_v26 = vpack.c.bf16 %v936_v25, %v935_v23  ;;  %1004 = vst [vmem:[#allocation10 + $0xf8] sm:$0xff] %v936_v25 }
 0x2de   : > { %1603 = shalt.err (!%p1600_p11)
}
 0x2df   : > { %s1604_s10 = scalar_lea.hbm %s1982_s4, 4096 }
 0x2e0   : > { %p1605_p13 = scmp.ne.s32.totalorder %s1982_s4, %s1604_s10  ;;  %p1610_p12 = scmp.lt.u32.totalorder %s1604_s10, %s1982_s4 }
 0x2e2   : > { %p1606_p2 = pnand %p1605_p13, %p1934_p7 }
 0x2e4   : > { %p1607_p3 = pneg %p1606_p2 }
 0x2e6   : > { %p1612_p0 = pnand %p1610_p12, %p1607_p3 }
 0x2e8   : > { %1615 = shalt.err (!%p1612_p0)
}
 0x2e9   : > { %s1688_s5 = smov 128   ;;  %s1689_s27 = smov 8   ;;  %972 = vst [vmem:[#allocation2 + $0x78] sm:$0xff] %v952_v26 }
 0x2ea   : > { %1377 = dma.vmem_to_hbm [thread:$0]  (%p1934_p7), %s1015_s22, 4096, %s1982_s4, [#allocation7], %s1688_s5, %s1688_s5, %s1689_s27  }
 0x2eb   : > { %1653 = dma.done.wait (%p1934_p7), [#allocation7], 4096  }
 0x2ec   : > { %1655 = vsyncadd (%p1934_p7), [#allocation7], 4294963200 }
 0x2ed PF: > { %s19_s20 = sadd.s32 1, %s1678_s20   ;;  %s1996_s15 = smov %s1662_s16 }
 0x2ee   : > { %p16_p6 = scmp.ge.s32.totalorder %s19_s20, 5   ;;  %s1997_s16 = smov %s1666_s17 }
 0x2ef   : > { %s1998_s17 = smov %s1800_s6  ;;  %s1999_s18 = smov %s1674_s19 }
 0x2f0   : > { %s2000_s19 = smov %s2002_s28  ;;  %18 = sbr.rel (!%p16_p6) target bundleno = 6 (0x6), region = 92 }
 0x2f7   :  { %1030 = vsyncpa [#allocation6], 1 }
 0x2f8   :  { %1032 = vsyncpa [#allocation6 + $0x1], 1 }
 0x2f9   :  { %1033 = vsyncpa [#allocation9], 1 }
 0x2fa   :  { %1035 = vsyncpa [#allocation9 + $0x1], 1 }
 0x2fb   :  { %1036 = vsyncpa [#allocation7], 1 }
 0x2fc   :  { %1038 = vsyncpa [#allocation7 + $0x1], 1 }
 0x2fd   :  { %1039 = vsyncmov [#allocation4] }
 0x300   :  { %s1040_s12 = vpop.sfrf %1039 }
 0x301   :  { %p1165_p7 = scmp.ne.s32.totalorder %s1040_s12, 0 }
 0x303   :  { %1044 = shalt.err (%p1165_p7)  }

</bundles_post_ra>
